<compile_context>
chip_gen: v6e
topology: v6e:2x2x1
jax: 0.10.0
libtpu: 0.0.40
codegen_flags: <defaults>
</compile_context>

<pallas_src>
import functools

import jax
import jax.numpy as jnp
from jax.experimental import pallas as pl
from jax.experimental.pallas import tpu as pltpu


def _fexs4_kernel(h_ref, u_ref, gi_ref, gu_ref, o_ref, *, pooling):
    h = h_ref[...]            # (Bt, L, F)
    u = u_ref[...]            # (Bt, F)
    gi = gi_ref[...]          # (1, F)   gate_item as a row
    gu = gu_ref[...]          # (L, F)   gate_user pre-transposed

    # score[b, l] = sigmoid( sum_f h[b,l,f]*gi[f] + sum_f u[b,f]*gu[l,f] )
    s_item = jnp.sum(h * gi[None, :, :], axis=-1)                # (Bt, L)  VPU mul + lane reduce
    s_user = jnp.sum(u[:, None, :] * gu[None, :, :], axis=-1)    # (Bt, L)  VPU mul + lane reduce
    score = jax.nn.sigmoid(s_item + s_user)                      # (Bt, L)  EUP
    weighted = h * score[:, :, None]                             # (Bt, L, F)

    if pooling == "Avg":
        num = jnp.sum(weighted, axis=1)                          # (Bt, F)  sublane reduce
        den = jnp.sum(score, axis=1, keepdims=True)              # (Bt, 1)
        o_ref[...] = num * pl.reciprocal(den, approx=False)      # EUP reciprocal
    elif pooling == "Max":
        L = h.shape[1]
        iota_l = jax.lax.broadcasted_iota(jnp.int32, score.shape, 1)   # (Bt, L)
        max_s = jnp.max(score, axis=1, keepdims=True)                  # (Bt, 1)
        # first index attaining the max (matches torch.max tie-breaking)
        idx = jnp.min(jnp.where(score == max_s, iota_l, L),
                      axis=1, keepdims=True)                            # (Bt, 1)
        mask = (iota_l == idx)                                          # (Bt, L)
        o_ref[...] = jnp.sum(jnp.where(mask[:, :, None], weighted, 0.0),
                             axis=1)                                    # (Bt, F)
    else:
        raise Exception("no such method")


def fexs4_forward(history_item_em, user_em, gate_item, gate_user,
                  *, pooling="Avg", bt=None):
    """history_item_em: (B, L, F) f32, user_em: (B, F) f32 -> (B, F) f32."""
    B, L, F = history_item_em.shape
    if bt is None:
        bt = B                       # small B: a single dense grid step
    assert B % bt == 0, "batch chunk must divide B"
    n_steps = B // bt

    gi_row = gate_item.reshape(1, F)         # (1, F)  one-time wrapper reshape
    gu_t = jnp.transpose(gate_user)          # (L, F)  one-time wrapper transpose

    kernel = functools.partial(_fexs4_kernel, pooling=pooling)
    out = pl.pallas_call(
        kernel,
        out_shape=jax.ShapeDtypeStruct((B, F), jnp.float32),
        grid=(n_steps,),
        in_specs=[
            pl.BlockSpec((bt, L, F), lambda i: (i, 0, 0)),   # history_item_em
            pl.BlockSpec((bt, F), lambda i: (i, 0)),         # user_em
            pl.BlockSpec((1, F), lambda i: (0, 0)),          # gate_item row
            pl.BlockSpec((L, F), lambda i: (0, 0)),          # gate_user^T
        ],
        out_specs=pl.BlockSpec((bt, F), lambda i: (i, 0)),
        compiler_params=pltpu.CompilerParams(
            dimension_semantics=("parallel",)),
    )(history_item_em, user_em, gi_row, gu_t)
    return out


def _xavier_uniform(key, shape):
    # torch.nn.init.xavier_uniform_ on a 2-D tensor: fan_out = shape[0], fan_in = shape[1]
    fan_out, fan_in = shape
    bound = (6.0 / (fan_in + fan_out)) ** 0.5
    return jax.random.uniform(key, shape, jnp.float32, -bound, bound)


if __name__ == "__main__":
    # config: batchSize=2, input_length=8, numFactor=32
    B, L, F = 2, 8, 32

    key = jax.random.PRNGKey(0)
    k_h, k_u, k_gi, k_gu = jax.random.split(key, 4)

    history_item_em = jax.random.normal(k_h, (B, L, F), jnp.float32)
    user_em = jax.random.normal(k_u, (B, F), jnp.float32)
    instance_gate_item = _xavier_uniform(k_gi, (F, 1))
    instance_gate_user = _xavier_uniform(k_gu, (F, L))

    # pure-JAX reference of the PyTorch forward
    score_ref = jax.nn.sigmoid(
        jnp.squeeze(history_item_em @ instance_gate_item, -1)
        + user_em @ instance_gate_user)                      # (B, L)
    union_ref = history_item_em * score_ref[:, :, None]      # (B, L, F)
    ref_avg = jnp.sum(union_ref, axis=1) / jnp.sum(score_ref, axis=1, keepdims=True)
    idx_ref = jnp.argmax(score_ref, axis=1)                  # (B,)
    ref_max = union_ref[jnp.arange(B), idx_ref, :]           # (B, F)

    out_avg = jax.block_until_ready(
        fexs4_forward(history_item_em, user_em,
                      instance_gate_item, instance_gate_user, pooling="Avg"))
    out_max = jax.block_until_ready(
        fexs4_forward(history_item_em, user_em,
                      instance_gate_item, instance_gate_user, pooling="Max"))

    assert out_avg.shape == (B, F) and out_max.shape == (B, F)
    assert jnp.allclose(out_avg, ref_avg, rtol=1e-4, atol=1e-4)
    assert jnp.allclose(out_max, ref_max, rtol=1e-4, atol=1e-4)
    print("KERNEL_OK")
</pallas_src>

<mosaic_0001>
module attributes {stable_mosaic.version = 11 : i64} {
  func.func @_fexs4_kernel(%arg0: i32, %arg1: memref<2x8x32xf32, #tpu.memory_space<vmem>>, %arg2: memref<2x32xf32, #tpu.memory_space<vmem>>, %arg3: memref<1x32xf32, #tpu.memory_space<vmem>>, %arg4: memref<8x32xf32, #tpu.memory_space<vmem>>, %arg5: memref<2x32xf32, #tpu.memory_space<vmem>>) attributes {dimension_semantics = [#tpu.dimension_semantics<parallel>], iteration_bounds = array<i64: 1>, scalar_prefetch = 0 : i64, scratch_operands = 0 : i64, tpu.core_type = #tpu.core_type<tc>, window_params = [{transform_indices = @transform_0, window_bounds = array<i64: 2, 8, 32>}, {transform_indices = @transform_1, window_bounds = array<i64: 2, 32>}, {pipeline_mode = #tpu.pipeline_mode<synchronous>, transform_indices = @transform_2, window_bounds = array<i64: 1, 32>}, {pipeline_mode = #tpu.pipeline_mode<synchronous>, transform_indices = @transform_3, window_bounds = array<i64: 8, 32>}, {transform_indices = @transform_4, window_bounds = array<i64: 2, 32>}]} {
    %c0 = arith.constant 0 : index
    %c0_0 = arith.constant 0 : index
    %c0_1 = arith.constant 0 : index
    %0 = vector.load %arg1[%c0, %c0_0, %c0_1] : memref<2x8x32xf32, #tpu.memory_space<vmem>>, vector<2x8x32xf32>
    %c0_2 = arith.constant 0 : index
    %c0_3 = arith.constant 0 : index
    %1 = vector.load %arg2[%c0_2, %c0_3] : memref<2x32xf32, #tpu.memory_space<vmem>>, vector<2x32xf32>
    %c0_4 = arith.constant 0 : index
    %c0_5 = arith.constant 0 : index
    %2 = vector.load %arg3[%c0_4, %c0_5] : memref<1x32xf32, #tpu.memory_space<vmem>>, vector<1x32xf32>
    %c0_6 = arith.constant 0 : index
    %c0_7 = arith.constant 0 : index
    %3 = vector.load %arg4[%c0_6, %c0_7] : memref<8x32xf32, #tpu.memory_space<vmem>>, vector<8x32xf32>
    %4 = vector.shape_cast %2 : vector<1x32xf32> to vector<1x1x32xf32>
    %5 = vector.broadcast %4 : vector<1x1x32xf32> to vector<2x8x32xf32>
    %6 = arith.mulf %0, %5 : vector<2x8x32xf32>
    %cst = arith.constant dense<0.000000e+00> : vector<2x8xf32>
    %7 = vector.multi_reduction <add>, %6, %cst [2] : vector<2x8x32xf32> to vector<2x8xf32>
    %8 = vector.shape_cast %1 : vector<2x32xf32> to vector<2x1x32xf32>
    %9 = vector.shape_cast %3 : vector<8x32xf32> to vector<1x8x32xf32>
    %10 = vector.broadcast %8 : vector<2x1x32xf32> to vector<2x8x32xf32>
    %11 = vector.broadcast %9 : vector<1x8x32xf32> to vector<2x8x32xf32>
    %12 = arith.mulf %10, %11 : vector<2x8x32xf32>
    %cst_8 = arith.constant dense<0.000000e+00> : vector<2x8xf32>
    %13 = vector.multi_reduction <add>, %12, %cst_8 [2] : vector<2x8x32xf32> to vector<2x8xf32>
    %14 = arith.addf %7, %13 : vector<2x8xf32>
    %15 = arith.negf %14 : vector<2x8xf32>
    %16 = math.exp %15 : vector<2x8xf32>
    %cst_9 = arith.constant 1.000000e+00 : f32
    %17 = vector.broadcast %cst_9 : f32 to vector<2x8xf32>
    %18 = arith.addf %17, %16 : vector<2x8xf32>
    %19 = arith.divf %17, %18 : vector<2x8xf32>
    %20 = vector.shape_cast %19 : vector<2x8xf32> to vector<2x8x1xf32>
    %21 = vector.broadcast %20 : vector<2x8x1xf32> to vector<2x8x32xf32>
    %22 = arith.mulf %0, %21 : vector<2x8x32xf32>
    %cst_10 = arith.constant dense<0.000000e+00> : vector<2x32xf32>
    %23 = vector.multi_reduction <add>, %22, %cst_10 [1] : vector<2x8x32xf32> to vector<2x32xf32>
    %cst_11 = arith.constant dense<0.000000e+00> : vector<2xf32>
    %24 = vector.multi_reduction <add>, %19, %cst_11 [1] : vector<2x8xf32> to vector<2xf32>
    %25 = vector.shape_cast %24 : vector<2xf32> to vector<2x1xf32>
    %26 = tpu.reciprocal %25 : vector<2x1xf32> -> vector<2x1xf32>
    %27 = vector.broadcast %26 : vector<2x1xf32> to vector<2x32xf32>
    %28 = arith.mulf %23, %27 : vector<2x32xf32>
    %c0_12 = arith.constant 0 : index
    %c0_13 = arith.constant 0 : index
    %29 = vector.load %arg5[%c0_12, %c0_13] : memref<2x32xf32, #tpu.memory_space<vmem>>, vector<2x32xf32>
    tpu.vector_store %arg5[%c0_12, %c0_13], %28 {strides = array<i32>} : memref<2x32xf32, #tpu.memory_space<vmem>>, vector<2x32xf32>,
    return
  }
  func.func @transform_0(%arg0: i32) -> (i32, i32, i32) {
    %c0_i32 = arith.constant 0 : i32
    %c0_i32_0 = arith.constant 0 : i32
    %c0_i32_1 = arith.constant 0 : i32
    return %arg0, %c0_i32, %c0_i32_0 : i32, i32, i32
  }
  func.func @transform_1(%arg0: i32) -> (i32, i32) {
    %c0_i32 = arith.constant 0 : i32
    %c0_i32_0 = arith.constant 0 : i32
    return %arg0, %c0_i32 : i32, i32
  }
  func.func @transform_2(%arg0: i32) -> (i32, i32) {
    %c0_i32 = arith.constant 0 : i32
    %c0_i32_0 = arith.constant 0 : i32
    %c0_i32_1 = arith.constant 0 : i32
    return %c0_i32, %c0_i32_0 : i32, i32
  }
  func.func @transform_3(%arg0: i32) -> (i32, i32) {
    %c0_i32 = arith.constant 0 : i32
    %c0_i32_0 = arith.constant 0 : i32
    %c0_i32_1 = arith.constant 0 : i32
    return %c0_i32, %c0_i32_0 : i32, i32
  }
  func.func @transform_4(%arg0: i32) -> (i32, i32) {
    %c0_i32 = arith.constant 0 : i32
    %c0_i32_0 = arith.constant 0 : i32
    return %arg0, %c0_i32 : i32, i32
  }
}

</mosaic_0001>

<bundles_post_ra>
// kernel: tpu_custom_call.1
= control target key start
LH: loop header
LB: loop body
LE: loop exit
PB: predicated region body
PF: predicated region fallthrough
CT: control target
= control target key end

     0   :  { %9 = vsyncpa [#allocation3], 0  ;;  %s357_s0 = inlined_call_operand.hbm [shape: f32[2,8,32], index: 0, kind: input, shape index: {}]   ;;  %s358_s1 = inlined_call_operand.hbm [shape: f32[2,32], index: 1, kind: input, shape index: {}]   ;;  %s359_s2 = inlined_call_operand.vmem [shape: f32[1,32], index: 2, kind: input, shape index: {}]   ;;  %s360_s3 = inlined_call_operand.hbm [shape: f32[8,32], index: 3, kind: input, shape index: {}]   ;;  %s361_s4 = inlined_call_operand.hbm [shape: f32[2,32], index: 4, kind: output, shape index: {}]  }
   0x1   :  { %10 = vsyncpa [#allocation6], 0 }
   0x2   :  { %11 = vsyncpa [#allocation4], 0  ;;  %s302_s15 = smov [#allocation5]   ;;  %s303_s17 = smov [#allocation2]  }
   0x3   :  { %s30_s16 = sshll.u32 %s302_s15, 4  ;;  %s17_s18 = sshll.u32 %s303_s17, 4  ;;  %s31_s16 = int_to_ptr.vmem [resolvable:$true] %s30_s16  ;;  %s18_s18 = int_to_ptr.vmem [resolvable:$true] %s17_s18 }
   0x4   :  { %s224_s19 = scalar_lea.vmem %s31_s16, 32  ;;  %p229_p1 = scmp.lt.s32.totalorder %s31_s16, %s31_s16 }
   0x5   :  { %p225_p0 = scmp.ne.s32.totalorder %s31_s16, %s224_s19  ;;  %p230_p2 = scmp.lt.s32.totalorder %s224_s19, %s224_s19 }
   0x7   :  { %p231_p3 = por %p230_p2, %p229_p1 }
   0x9   :  { %p232_p4 = pnand %p231_p3, %p225_p0 }
   0xb   :  { %235 = shalt.err (!%p232_p4)
}
   0xc   :  { %33 = dma.hbm_to_vmem [thread:$0]  %s358_s1, 32, %s31_s16, [#allocation6]  }
   0xd   :  { %s244_s22 = scalar_lea.vmem %s18_s18, 256  ;;  %p249_p6 = scmp.lt.s32.totalorder %s18_s18, %s18_s18 }
   0xe   :  { %p245_p5 = scmp.ne.s32.totalorder %s18_s18, %s244_s22  ;;  %p250_p7 = scmp.lt.s32.totalorder %s244_s22, %s244_s22 }
  0x10   :  { %p251_p8 = por %p250_p7, %p249_p6 }
  0x12   :  { %p252_p9 = pnand %p251_p8, %p245_p5 }
  0x14   :  { %255 = shalt.err (!%p252_p9)
}
  0x15   :  { %s304_s23 = smov 128   ;;  %s305_s24 = smov 8  }
  0x16   :  { %23 = dma.hbm_to_vmem [thread:$0]  %s357_s0, 256, %s18_s18, [#allocation3], %s304_s23, %s304_s23, %s305_s24  }
  0x17   :  { %s306_s27 = smov [#allocation7]  }
  0x18   :  { %s42_s28 = sshll.u32 %s306_s27, 4  ;;  %s43_s28 = int_to_ptr.vmem [resolvable:$true] %s42_s28 }
  0x19   :  { %s264_s29 = scalar_lea.vmem %s43_s28, 128  ;;  %p269_p11 = scmp.lt.s32.totalorder %s43_s28, %s43_s28 }
  0x1a   :  { %p265_p10 = scmp.ne.s32.totalorder %s43_s28, %s264_s29  ;;  %p270_p12 = scmp.lt.s32.totalorder %s264_s29, %s264_s29 }
  0x1c   :  { %p271_p13 = por %p270_p12, %p269_p11 }
  0x1e   :  { %p272_p0 = pnand %p271_p13, %p265_p10 }
  0x20   :  { %275 = shalt.err (!%p272_p0)
}
  0x21   :  { %45 = dma.hbm_to_vmem [thread:$0]  %s360_s3, 128, %s43_s28, [#allocation6]  }
  0x22   :  { %296 = dma.done.wait [#allocation3], 256  }
  0x23   :  { %297 = vsyncadd [#allocation3], 4294967040 }
  0x24   :  { %298 = dma.done.wait [#allocation6], 160  }
  0x25   :  { %299 = vsyncadd [#allocation6], 4294967136  ;;  %v87_v0 = vlaneseq  ;;  %v307_v1 = vmov 1966171168   ;;  %v55_v8 = vld [vmem:[#allocation2] sm:$0xff]  ;;  %vm68_vm0 = vcmask 261120  }
  0x26   :  { %v85_v2 = vunpack.c.l.s4 %v307_v1  ;;  %v196_v7 = vld.sshfl [vmem:[#allocation5] sm:$0x11 pattern:$0x75316420]  ;;  %v195_v11 = vld [vmem:[%s359_s2] ss:$0 sm:$0xff] }
  0x27   :  { %v88_v3 = vshrl.u32 %v87_v0, 7  ;;  %v83_v10 = vcombine.high %v196_v7, %v196_v7  ;;  %v56_v12 = vld [vmem:[#allocation2 + $0x8] sm:$0xff]  ;;  %v59_v13 = vld [vmem:[#allocation7] sm:$0xff]  ;;  %v66_v14 = vmul.f32 %v195_v11, %v55_v8  ;;  %v149_v25 = vand.u32 127, %v87_v0  ;;  %s308_s2 = smov [#allocation8]  }
  0x28   :  { %v86_v4 = vunpack.c.0.s8 %v85_v2  ;;  %v67_v15 = vmul.f32 %v195_v11, %v56_v12  ;;  %vm158_vm1 = vcmask 1041409   ;;  %vm161_vm2 = vcmask 58368   ;;  %s185_s3 = sshll.u32 %s308_s2, 4  ;;  %s186_s3 = int_to_ptr.vmem [resolvable:$true] %s185_s3 }
  0x29   :  { %v100_v6 = vsub.s32 0, %v88_v3  ;;  %v69_v18 = vsel %vm68_vm0, %v66_v14, 0.0  ;;  %v152_v26 = vsub.s32 %v149_v25, %v88_v3  ;;  %vm177_vm3 = vcmask 254976   ;;  %s276_s6 = scalar_lea.vmem %s186_s3, 32  ;;  %p281_p2 = scmp.lt.s32.totalorder %s186_s3, %s186_s3 }
  0x2a   :  { %v89_v5 = vsub.s32 %v86_v4, %v88_v3  ;;  %70 = vadd.xlane.f32.xlu0 %v69_v18  ;;  %v72_v21 = vsel %vm68_vm0, %v67_v15, 0.0  ;;  %p277_p1 = scmp.ne.s32.totalorder %s186_s3, %s276_s6  ;;  %p282_p3 = scmp.lt.s32.totalorder %s276_s6, %s276_s6 }
  0x2c   :  { %v90_v9 = vrot.slane %v196_v7, %v89_v5  ;;  %v97_v17 = vrot.slane %v83_v10, %v89_v5  ;;  %p283_p4 = por %p282_p3, %p281_p2 }
  0x2e   :  { %v101_v16 = vrot.slane %v90_v9, %v100_v6  ;;  %v105_v20 = vrot.slane %v97_v17, %v100_v6  ;;  %73 = vadd.xlane.f32.xlu0 %v72_v21  ;;  %p284_p5 = pnand %p283_p4, %p277_p1 }
  0x30   :  { %v108_v19 = vmul.f32 %v101_v16, %v59_v13  ;;  %v109_v23 = vmul.f32 %v105_v20, %v59_v13 }
  0x32   :  { %v110_v22 = vsel %vm68_vm0, %v108_v19, 0.0  ;;  %v113_v24 = vsel %vm68_vm0, %v109_v23, 0.0 }
  0x33   :  { %111 = vadd.xlane.f32.xlu1 %v110_v22 }
  0x37   :  { %114 = vadd.xlane.f32.xlu1 %v113_v24 }
  0xb3   :  { %v71_v27 = vpop.xlane.xlu0 %70 }
  0xb7   :  { %v74_v30 = vpop.xlane.xlu0 %73 }
  0xbc   :  { %v112_v28 = vpop.xlane.xlu1 %111 }
  0xbd   :  { %v116_v29 = vadd.f32 %v112_v28, %v71_v27 }
  0xbf   :  { %v197_v31 = vmul.f32 -1.442695, %v116_v29 }
  0xc0   :  { %v115_v32 = vpop.xlane.xlu1 %114 }
  0xc1   :  { %206 = vpow2.f32 %v197_v31  ;;  %v117_v33 = vadd.f32 %v115_v32, %v74_v30 }
  0xc3   :  { %v198_v34 = vmul.f32 -1.442695, %v117_v33 }
  0xc5   :  { %208 = vpow2.f32 %v198_v34 }
  0xce   :  { %v207_v35 = vpop.eup %206 }
  0xcf   :  { %v124_v36 = vadd.f32 1.0, %v207_v35 }
  0xd1   :  { %210 = vrcp.f32 %v124_v36 }
  0xd2   :  { %v209_v37 = vpop.eup %208 }
  0xd3   :  { %v125_v38 = vadd.f32 1.0, %v209_v37 }
  0xd5   :  { %212 = vrcp.f32 %v125_v38 }
  0xde   :  { %v211_v39 = vpop.eup %210 }
  0xdf   :  { %v153_v41 = vrot.slane %v211_v39, %v152_v26  ;;  %v130_v46 = vmul.f32 %v211_v39, %v55_v8 }
  0xe1   :  { %v132_v48 = vsel %vm68_vm0, %v130_v46, 0.0 }
  0xe2   :  { %v213_v40 = vpop.eup %212  ;;  %v133_v50 = vrot.slane %v132_v48, 4 }
  0xe3   :  { %v157_v42 = vrot.slane %v213_v40, %v152_v26  ;;  %v131_v45 = vmul.f32 %v213_v40, %v56_v12 }
  0xe4   :  { %v134_v53 = vadd.f32 %v133_v50, %v132_v48 }
  0xe5   :  { %v159_v43 = vsel %vm158_vm1, %v157_v42, %v153_v41  ;;  %v139_v47 = vsel %vm68_vm0, %v131_v45, 0.0 }
  0xe6   :  { %v162_v44 = vsel %vm161_vm2, %v159_v43, 0.0  ;;  %v140_v49 = vrot.slane %v139_v47, 4  ;;  %v135_v55 = vrot.slane %v134_v53, 2 }
  0xe7   :  { %163 = vadd.xlane.f32.xlu0 %v162_v44 }
  0xe8   :  { %v141_v51 = vadd.f32 %v140_v49, %v139_v47  ;;  %v136_v57 = vadd.f32 %v135_v55, %v134_v53 }
  0xea   :  { %v142_v54 = vrot.slane %v141_v51, 2  ;;  %v137_v59 = vrot.slane %v136_v57, 1 }
  0xec   :  { %v143_v56 = vadd.f32 %v142_v54, %v141_v51  ;;  %v138_v63 = vadd.f32 %v137_v59, %v136_v57 }
  0xee   :  { %v144_v58 = vrot.slane %v143_v56, 1 }
  0xf0   :  { %v145_v61 = vadd.f32 %v144_v58, %v143_v56 }
 0x170   :  { %v164_v52 = vpop.xlane.xlu0 %163 }
 0x171   :  { %214 = vrcp.f32 %v164_v52 }
 0x17e   :  { %v215_v60 = vpop.eup %214 }
 0x17f   :  { %v167_v62 = vrot.slane %v215_v60, 1  ;;  %v170_v1 = vmul.f32 %v215_v60, %v138_v63 }
 0x181   :  { %v171_v0 = vmul.f32 %v167_v62, %v145_v61 }
 0x183   :  { %v174_v2 = vrot.slane %v171_v0, 7 }
 0x185   :  { %v175_v3 = vsel %vm158_vm1, %v174_v2, %v170_v1 }
 0x186   :  { %178 = vst.msk [vmem:[#allocation8] sm:$0x3] %vm177_vm3, %v175_v3 }
 0x187   :  { %287 = shalt.err (!%p284_p5)
}
 0x188   :  { %188 = dma.vmem_to_hbm [thread:$0]  %s186_s3, 32, %s361_s4, [#allocation4]  }
 0x189   :  { %300 = dma.done.wait [#allocation4], 32  }
 0x18a   :  { %301 = vsyncadd [#allocation4], 4294967264 }
 0x18b   :  { %192 = vsyncpa [#allocation3], 1 }
 0x18c   :  { %193 = vsyncpa [#allocation6], 1 }
 0x18d   :  { %194 = vsyncpa [#allocation4], 1 }

</bundles_post_ra>
